<compile_context>
chip_gen: v7x
topology: tpu7x:2x2x1
jax: 0.10.0
libtpu: 0.0.40
codegen_flags: <defaults>
</compile_context>

<pallas_src>
import functools

import jax
import jax.numpy as jnp
from jax.experimental import pallas as pl
from jax.experimental.pallas import tpu as pltpu

LANE = 128


def _default_num_cores():
    try:
        return int(getattr(jax.devices()[0], "num_cores", 1) or 1)
    except Exception:
        return 1


def _focal_sum_kernel(p_ref, t_ref, out_ref, *, chunk_r, n_chunks, block_r,
                      blocks_per_core, total_blocks, rows_total, acc_rows,
                      mask_possible, unroll):
    c = pl.program_id(0)
    i = pl.program_id(1)

    @pl.when(i == 0)
    def _init():
        out_ref[...] = jnp.zeros_like(out_ref)

    g = c * blocks_per_core + i          # logical block index
    block_start = g * block_r            # first logical row of this block

    def accumulate(masked):
        def body(k, carry):
            r0 = pl.multiple_of(k * chunk_r, chunk_r)
            p = p_ref[pl.ds(r0, chunk_r), :].astype(jnp.float32)
            t = t_ref[pl.ds(r0, chunk_r), :].astype(jnp.float32)
            if masked:
                # Rows past the end of the array (ragged last block or a
                # clamped duplicate block) contribute exactly zero: p,t -> 1
                # gives BCE == 0 after the log clamp, even if the overhang
                # holds garbage.
                row = (jax.lax.broadcasted_iota(jnp.int32, p.shape, 0)
                       + block_start + r0)
                ok = row < rows_total
                p = jnp.where(ok, p, 1.0)
                t = jnp.where(ok, t, 1.0)
            # Exact PyTorch binary_cross_entropy: per-term log clamp at -100.
            log_p = jnp.maximum(jnp.log(p), -100.0)
            log_1mp = jnp.maximum(jnp.log(1.0 - p), -100.0)
            bce = -(t * log_p + (1.0 - t) * log_1mp)
            # Tile-aligned halving fold (chunk_r, C) -> (acc_rows, C).
            x = bce
            r = chunk_r
            while r > acc_rows:
                h = r // 2
                x = x[:h, :] + x[h:, :]
                r = h
            out_ref[...] += x
            return carry

        jax.lax.fori_loop(0, n_chunks, body, 0, unroll=unroll)

    if mask_possible:
        full = jnp.logical_and(g < total_blocks,
                               block_start + block_r <= rows_total)

        @pl.when(full)
        def _hot():
            accumulate(masked=False)

        @pl.when(jnp.logical_not(full))
        def _cold():
            accumulate(masked=True)
    else:
        accumulate(masked=False)


def focal_loss(inputs, targets, *, alpha=0.8, gamma=2.0, block_rows=2048,
               num_cores=None):
    """Pallas TPU focal loss.  `inputs` are probabilities in [0, 1]."""
    n = int(inputs.size)
    if n == 0:
        return jnp.float32(0.0)

    # Zero-extra-pass 2-D view (rows, cols) of the flattened data.
    if n % LANE == 0:
        cols = LANE                       # lane-dense fast path
    elif inputs.ndim >= 2:
        cols = int(inputs.shape[-1])      # full-last-dim blocks, no padding
    else:
        # TODO(synk): huge ragged 1-D inputs land in a single (1, n) block.
        cols = n
    rows = n // cols

    p2 = inputs.reshape(rows, cols)
    t2 = targets.reshape(rows, cols)      # incoming dtype kept, no cast pass

    # --- static tiling ------------------------------------------------------
    if rows >= 8:
        chunk_r = 8
        while chunk_r * 2 <= min(rows, 64):
            chunk_r *= 2                  # 8,16,32,64: power-of-two fold
        acc_rows = 8
    else:
        chunk_r = rows                    # tiny input: full-dim block, no fold
        acc_rows = rows

    max_chunks = max(1, rows // chunk_r)          # keep block_r <= rows
    want_chunks = max(1, int(block_rows) // chunk_r)
    n_chunks = min(want_chunks, max_chunks)
    block_r = chunk_r * n_chunks

    total_blocks = pl.cdiv(rows, block_r)

    if num_cores is None:
        num_cores = _default_num_cores()
    num_cores = max(1, min(int(num_cores), 2, total_blocks))
    blocks_per_core = pl.cdiv(total_blocks, num_cores)

    mask_possible = (rows % block_r != 0) or (total_blocks % num_cores != 0)

    if total_blocks % num_cores == 0:
        def in_map(c, i):
            return (c * blocks_per_core + i, 0)
    else:
        def in_map(c, i):
            # Clamp so a (fully masked) duplicate block is fetched instead of
            # an out-of-range one.
            return (jnp.minimum(c * blocks_per_core + i, total_blocks - 1), 0)

    kernel = functools.partial(
        _focal_sum_kernel,
        chunk_r=chunk_r, n_chunks=n_chunks, block_r=block_r,
        blocks_per_core=blocks_per_core, total_blocks=total_blocks,
        rows_total=rows, acc_rows=acc_rows, mask_possible=mask_possible,
        unroll=max(1, min(n_chunks, 8)))

    partials = pl.pallas_call(
        kernel,
        out_shape=jax.ShapeDtypeStruct((num_cores * acc_rows, cols),
                                       jnp.float32),
        grid_spec=pltpu.PrefetchScalarGridSpec(
            num_scalar_prefetch=0,
            grid=(num_cores, blocks_per_core),
            in_specs=[
                pl.BlockSpec((block_r, cols), in_map),
                pl.BlockSpec((block_r, cols), in_map),
            ],
            out_specs=pl.BlockSpec((acc_rows, cols), lambda c, i: (c, 0)),
        ),
        compiler_params=pltpu.CompilerParams(
            dimension_semantics=("parallel", "arbitrary")),
    )(p2, t2)

    # Final cross-core / cross-lane reduction + scalar focal transform
    # (a handful of flops) in plain JAX.
    bce_mean = jnp.sum(partials) / jnp.float32(n)
    return alpha * (1.0 - jnp.exp(-bce_mean)) ** gamma * bce_mean


def focal_loss_ref(inputs, targets, alpha=0.8, gamma=2.0):
    """Pure-JAX reference matching PyTorch F.binary_cross_entropy + focal."""
    p = inputs.reshape(-1).astype(jnp.float32)
    t = targets.reshape(-1).astype(jnp.float32)
    log_p = jnp.maximum(jnp.log(p), -100.0)
    log_1mp = jnp.maximum(jnp.log(1.0 - p), -100.0)
    bce = jnp.mean(-(t * log_p + (1.0 - t) * log_1mp))
    return alpha * (1.0 - jnp.exp(-bce)) ** gamma * bce


if __name__ == "__main__":
    key = jax.random.PRNGKey(0)
    k1, k2, k3, k4 = jax.random.split(key, 4)

    # Primary: NCHW probabilities + binary targets, batch=2, channels=4, 16x16.
    x = jax.random.uniform(k1, (2, 4, 16, 16), dtype=jnp.float32,
                           minval=1e-4, maxval=1.0 - 1e-4)
    y = jax.random.bernoulli(k2, p=0.5, shape=(2, 4, 16, 16)).astype(jnp.float32)

    loss = jax.block_until_ready(focal_loss(x, y, alpha=0.8, gamma=2.0))
    ref = focal_loss_ref(x, y, alpha=0.8, gamma=2.0)
    assert jnp.allclose(loss, ref, rtol=1e-5, atol=1e-6), (loss, ref)

    # Secondary: ragged numel (% 128 != 0) exercising the full-last-dim view,
    # the pl.when-gated masked overhang block and the 2-way core split.
    x2 = jax.random.uniform(k3, (2, 4, 37, 29), dtype=jnp.float32,
                            minval=1e-4, maxval=1.0 - 1e-4)
    y2 = jax.random.bernoulli(k4, p=0.5, shape=(2, 4, 37, 29)).astype(jnp.float32)

    loss2 = jax.block_until_ready(
        focal_loss(x2, y2, alpha=0.8, gamma=2.0, block_rows=256, num_cores=2))
    ref2 = focal_loss_ref(x2, y2, alpha=0.8, gamma=2.0)
    assert jnp.allclose(loss2, ref2, rtol=1e-5, atol=1e-6), (loss2, ref2)

    # Tertiary: soft (non-binary) targets — exact BCE semantics preserved.
    y3 = jax.random.uniform(k2, (2, 4, 16, 16), dtype=jnp.float32)
    loss3 = jax.block_until_ready(focal_loss(x, y3, alpha=0.8, gamma=2.0))
    ref3 = focal_loss_ref(x, y3, alpha=0.8, gamma=2.0)
    assert jnp.allclose(loss3, ref3, rtol=1e-5, atol=1e-6), (loss3, ref3)

    print("KERNEL_OK")
</pallas_src>

<mosaic_0001>
module attributes {stable_mosaic.version = 11 : i64} {
  func.func @_focal_sum_kernel(%arg0: i32, %arg1: i32, %arg2: memref<16x128xf32, #tpu.memory_space<vmem>>, %arg3: memref<16x128xf32, #tpu.memory_space<vmem>>, %arg4: memref<8x128xf32, #tpu.memory_space<vmem>>) attributes {dimension_semantics = [#tpu.dimension_semantics<parallel>, #tpu.dimension_semantics<arbitrary>], iteration_bounds = array<i64: 1, 1>, scalar_prefetch = 0 : i64, scratch_operands = 0 : i64, tpu.core_type = #tpu.core_type<tc>, window_params = [{transform_indices = @transform_0, window_bounds = array<i64: 16, 128>}, {transform_indices = @transform_1, window_bounds = array<i64: 16, 128>}, {transform_indices = @transform_2, window_bounds = array<i64: 8, 128>}]} {
    %c0_i32 = arith.constant 0 : i32
    %0 = arith.cmpi eq, %arg1, %c0_i32 : i32
    %1 = arith.extui %0 : i1 to i32
    %c0_i32_0 = arith.constant 0 : i32
    %2 = arith.cmpi ne, %1, %c0_i32_0 : i32
    scf.if %2 {
      %cst_11 = arith.constant 0.000000e+00 : f32
      %30 = vector.broadcast %cst_11 : f32 to vector<8x128xf32>
      %c0_12 = arith.constant 0 : index
      %c0_13 = arith.constant 0 : index
      %31 = vector.load %arg4[%c0_12, %c0_13] : memref<8x128xf32, #tpu.memory_space<vmem>>, vector<8x128xf32>
      tpu.vector_store %arg4[%c0_12, %c0_13], %30 {strides = array<i32>} : memref<8x128xf32, #tpu.memory_space<vmem>>, vector<8x128xf32>,
    } else {
    }
    %c0_i32_1 = arith.constant 0 : i32
    %c16_i32 = arith.constant 16 : i32
    %3 = arith.muli %c0_i32_1, %c16_i32 : i32
    %4 = tpu.assume_multiple %3, 16 : i32
    %5 = arith.index_cast %4 : i32 to index
    %c0 = arith.constant 0 : index
    %6 = vector.load %arg2[%5, %c0] : memref<16x128xf32, #tpu.memory_space<vmem>>, vector<16x128xf32>
    %7 = arith.index_cast %4 : i32 to index
    %c0_2 = arith.constant 0 : index
    %8 = vector.load %arg3[%7, %c0_2] : memref<16x128xf32, #tpu.memory_space<vmem>>, vector<16x128xf32>
    %9 = math.log %6 : vector<16x128xf32>
    %cst = arith.constant -1.000000e+02 : f32
    %10 = vector.broadcast %cst : f32 to vector<16x128xf32>
    %11 = arith.maximumf %9, %10 : vector<16x128xf32>
    %cst_3 = arith.constant 1.000000e+00 : f32
    %12 = vector.broadcast %cst_3 : f32 to vector<16x128xf32>
    %13 = arith.subf %12, %6 : vector<16x128xf32>
    %14 = math.log %13 : vector<16x128xf32>
    %cst_4 = arith.constant -1.000000e+02 : f32
    %15 = vector.broadcast %cst_4 : f32 to vector<16x128xf32>
    %16 = arith.maximumf %14, %15 : vector<16x128xf32>
    %17 = arith.mulf %8, %11 : vector<16x128xf32>
    %cst_5 = arith.constant 1.000000e+00 : f32
    %18 = vector.broadcast %cst_5 : f32 to vector<16x128xf32>
    %19 = arith.subf %18, %8 : vector<16x128xf32>
    %20 = arith.mulf %19, %16 : vector<16x128xf32>
    %21 = arith.addf %17, %20 : vector<16x128xf32>
    %cst_6 = arith.constant 0.000000e+00 : f32
    %22 = vector.broadcast %cst_6 : f32 to vector<16x128xf32>
    %23 = arith.subf %22, %21 : vector<16x128xf32>
    %24 = vector.extract_strided_slice %23 {offsets = [0, 0], sizes = [8, 128], strides = [1, 1]} : vector<16x128xf32> to vector<8x128xf32>
    %25 = vector.extract_strided_slice %23 {offsets = [8, 0], sizes = [8, 128], strides = [1, 1]} : vector<16x128xf32> to vector<8x128xf32>
    %26 = arith.addf %24, %25 : vector<8x128xf32>
    %c0_7 = arith.constant 0 : index
    %c0_8 = arith.constant 0 : index
    %27 = vector.load %arg4[%c0_7, %c0_8] : memref<8x128xf32, #tpu.memory_space<vmem>>, vector<8x128xf32>
    %28 = arith.addf %27, %26 : vector<8x128xf32>
    %c0_9 = arith.constant 0 : index
    %c0_10 = arith.constant 0 : index
    %29 = vector.load %arg4[%c0_9, %c0_10] : memref<8x128xf32, #tpu.memory_space<vmem>>, vector<8x128xf32>
    tpu.vector_store %arg4[%c0_9, %c0_10], %28 {strides = array<i32>} : memref<8x128xf32, #tpu.memory_space<vmem>>, vector<8x128xf32>,
    %c1_i32 = arith.constant 1 : i32
    return
  }
  func.func @transform_0(%arg0: i32, %arg1: i32) -> (i32, i32) {
    %c1_i32 = arith.constant 1 : i32
    %0 = arith.muli %arg0, %c1_i32 : i32
    %1 = arith.addi %0, %arg1 : i32
    %c0_i32 = arith.constant 0 : i32
    %c0_i32_0 = arith.constant 0 : i32
    return %1, %c0_i32 : i32, i32
  }
  func.func @transform_1(%arg0: i32, %arg1: i32) -> (i32, i32) {
    %c1_i32 = arith.constant 1 : i32
    %0 = arith.muli %arg0, %c1_i32 : i32
    %1 = arith.addi %0, %arg1 : i32
    %c0_i32 = arith.constant 0 : i32
    %c0_i32_0 = arith.constant 0 : i32
    return %1, %c0_i32 : i32, i32
  }
  func.func @transform_2(%arg0: i32, %arg1: i32) -> (i32, i32) {
    %c0_i32 = arith.constant 0 : i32
    %c0_i32_0 = arith.constant 0 : i32
    return %arg0, %c0_i32 : i32, i32
  }
}

</mosaic_0001>

<bundles_post_ra>
// kernel: tpu_custom_call.1
= control target key start
LH: loop header
LB: loop body
LE: loop exit
PB: predicated region body
PF: predicated region fallthrough
CT: control target
= control target key end

     0   :  { %7 = vsyncpa [#allocation3], 0  ;;  %s247_s0 = inlined_call_operand.hbm [shape: f32[16,128], index: 0, kind: input, shape index: {}]   ;;  %s248_s1 = inlined_call_operand.hbm [shape: f32[16,128], index: 1, kind: input, shape index: {}]   ;;  %s249_s2 = inlined_call_operand.hbm [shape: f32[8,128], index: 2, kind: output, shape index: {}]  }
   0x1   :  { %8 = vsyncpa [#allocation6], 0 }
   0x2   :  { %9 = vsyncpa [#allocation4], 0  ;;  %s191_s9 = smov [#allocation2]   ;;  %s119_s13 = scalar_lea.hbm %s247_s0, 256 }
   0x3   :  { %s19_s10 = sshll.u32 %s191_s9, 4  ;;  %p120_p0 = scmp.ne.s32.totalorder %s247_s0, %s119_s13  ;;  %s20_s10 = int_to_ptr.vmem [resolvable:$true] %s19_s10 }
   0x4   :  { %p123_p1 = scmp.lt.u32.totalorder %s119_s13, %s247_s0 }
   0x6   :  { %p125_p2 = pnand %p123_p1, %p120_p0 }
   0x8   :  { %128 = shalt.err (!%p125_p2)
}
   0x9   :  { %s129_s18 = scalar_lea.vmem %s20_s10, 256  ;;  %p134_p4 = scmp.lt.s32.totalorder %s20_s10, %s20_s10 }
   0xa   :  { %p130_p3 = scmp.ne.s32.totalorder %s20_s10, %s129_s18  ;;  %p135_p5 = scmp.lt.s32.totalorder %s129_s18, %s129_s18 }
   0xc   :  { %p136_p6 = por %p135_p5, %p134_p4 }
   0xe   :  { %p137_p7 = pnand %p136_p6, %p130_p3 }
  0x10   :  { %140 = shalt.err (!%p137_p7)
}
  0x11   :  { %s192_s19 = smov 128   ;;  %s193_s20 = smov 8  }
  0x12   :  { %25 = dma.hbm_to_vmem [thread:$0]  %s247_s0, 256, %s20_s10, [#allocation3], %s192_s19, %s192_s19, %s193_s20  }
  0x13   :  { %s194_s23 = smov [#allocation5]   ;;  %s141_s27 = scalar_lea.hbm %s248_s1, 256 }
  0x14   :  { %s35_s24 = sshll.u32 %s194_s23, 4  ;;  %p142_p8 = scmp.ne.s32.totalorder %s248_s1, %s141_s27  ;;  %s36_s24 = int_to_ptr.vmem [resolvable:$true] %s35_s24 }
  0x15   :  { %p145_p9 = scmp.lt.u32.totalorder %s141_s27, %s248_s1 }
  0x17   :  { %p147_p10 = pnand %p145_p9, %p142_p8 }
  0x19   :  { %150 = shalt.err (!%p147_p10)
}
  0x1a   :  { %s151_s4 = scalar_lea.vmem %s36_s24, 256  ;;  %p156_p12 = scmp.lt.s32.totalorder %s36_s24, %s36_s24 }
  0x1b   :  { %p152_p11 = scmp.ne.s32.totalorder %s36_s24, %s151_s4  ;;  %p157_p13 = scmp.lt.s32.totalorder %s151_s4, %s151_s4 }
  0x1d   :  { %p158_p0 = por %p157_p13, %p156_p12 }
  0x1f   :  { %p159_p1 = pnand %p158_p0, %p152_p11 }
  0x21   :  { %162 = shalt.err (!%p159_p1)
}
  0x22   :  { %41 = dma.hbm_to_vmem [thread:$0]  %s248_s1, 256, %s36_s24, [#allocation6], %s192_s19, %s192_s19, %s193_s20  }
  0x23   :  { %185 = dma.done.wait [#allocation3], 256  }
  0x24   :  { %186 = vsyncadd [#allocation3], 4294967040 }
  0x25   :  { %187 = dma.done.wait [#allocation6], 256  }
  0x26   :  { %188 = vsyncadd [#allocation6], 4294967040  ;;  %v57_v0 = vld [vmem:[#allocation2] sm:$0xff]  ;;  %v58_v1 = vld [vmem:[#allocation2 + $0x8] sm:$0xff]  ;;  %s195_s1 = smov [#allocation7]  }
  0x27   :  { %111 = vlog2.f32 %v57_v0  ;;  %v67_v2 = vsub.f32 1.0, %v57_v0  ;;  %v68_v3 = vsub.f32 1.0, %v58_v1  ;;  %v59_v5 = vld [vmem:[#allocation5] sm:$0xff]  ;;  %v60_v7 = vld [vmem:[#allocation5 + $0x8] sm:$0xff]  ;;  %s95_s6 = sshll.u32 %s195_s1, 4  ;;  %s96_s6 = int_to_ptr.vmem [resolvable:$true] %s95_s6 }
  0x28   :  { %113 = vlog2.f32 %v58_v1  ;;  %v77_v14 = vsub.f32 1.0, %v59_v5  ;;  %v78_v17 = vsub.f32 1.0, %v60_v7  ;;  %s163_s7 = scalar_lea.vmem %s96_s6, 128  ;;  %p168_p3 = scmp.lt.s32.totalorder %s96_s6, %s96_s6 }
  0x29   :  { %115 = vlog2.f32 %v67_v2  ;;  %p164_p2 = scmp.ne.s32.totalorder %s96_s6, %s163_s7  ;;  %p169_p4 = scmp.lt.s32.totalorder %s163_s7, %s163_s7 }
  0x2a   :  { %117 = vlog2.f32 %v68_v3 }
  0x2b   :  { %p170_p5 = por %p169_p4, %p168_p3 }
  0x2d   :  { %p171_p6 = pnand %p170_p5, %p164_p2 }
  0x31   :  { %v112_v4 = vpop.eup %111 }
  0x32   :  { %v114_v6 = vpop.eup %113  ;;  %v62_v8 = vmul.f32 0.6931472, %v112_v4 }
  0x33   :  { %v116_v9 = vpop.eup %115  ;;  %v64_v10 = vmul.f32 0.6931472, %v114_v6 }
  0x34   :  { %v118_v11 = vpop.eup %117  ;;  %v65_v12 = vmax.f32 %v62_v8, -100.0  ;;  %v70_v13 = vmul.f32 0.6931472, %v116_v9 }
  0x35   :  { %v66_v15 = vmax.f32 %v64_v10, -100.0  ;;  %v72_v16 = vmul.f32 0.6931472, %v118_v11 }
  0x36   :  { %v73_v18 = vmax.f32 %v70_v13, -100.0  ;;  %v75_v19 = vmul.f32 %v65_v12, %v59_v5 }
  0x37   :  { %v74_v20 = vmax.f32 %v72_v16, -100.0  ;;  %v76_v21 = vmul.f32 %v66_v15, %v60_v7 }
  0x38   :  { %v79_v22 = vmul.f32 %v77_v14, %v73_v18 }
  0x39   :  { %v80_v23 = vmul.f32 %v78_v17, %v74_v20 }
  0x3a   :  { %v81_v24 = vadd.f32 %v79_v22, %v75_v19 }
  0x3b   :  { %v82_v25 = vadd.f32 %v80_v23, %v76_v21 }
  0x3c   :  { %v83_v26 = vsub.f32 0.0, %v81_v24 }
  0x3d   :  { %v84_v27 = vsub.f32 0.0, %v82_v25 }
  0x3f   :  { %v85_v28 = vadd.f32 %v84_v27, %v83_v26 }
  0x41   :  { %88 = vst [vmem:[#allocation7] sm:$0xff] %v85_v28 }
  0x42   :  { %174 = shalt.err (!%p171_p6)
}
  0x43   :  { %s175_s10 = scalar_lea.hbm %s249_s2, 128 }
  0x44   :  { %p176_p7 = scmp.ne.s32.totalorder %s249_s2, %s175_s10  ;;  %p179_p8 = scmp.lt.u32.totalorder %s175_s10, %s249_s2 }
  0x46   :  { %p181_p9 = pnand %p179_p8, %p176_p7 }
  0x48   :  { %184 = shalt.err (!%p181_p9)
}
  0x49   :  { %98 = dma.vmem_to_hbm [thread:$0]  %s96_s6, 128, %s249_s2, [#allocation4]  }
  0x4a   :  { %189 = dma.done.wait [#allocation4], 128  }
  0x4b   :  { %190 = vsyncadd [#allocation4], 4294967168 }
  0x4c   :  { %102 = vsyncpa [#allocation3], 1 }
  0x4d   :  { %103 = vsyncpa [#allocation6], 1 }
  0x4e   :  { %104 = vsyncpa [#allocation4], 1 }

</bundles_post_ra>
